<compile_context>
chip_gen: v5e
topology: v5e:2x2
jax: 0.10.0
libtpu: 0.0.40
codegen_flags: <defaults>
</compile_context>

<pallas_src>
import jax
import jax.numpy as jnp
from jax.experimental import pallas as pl
from jax.experimental.pallas import tpu as pltpu


def _pca_kernel_vpu(x_ref, w_ref, b_ref, o_ref):
    # x_ref: (1, C, TN) VMEM | w_ref: (K, C) VMEM | b_ref: (K, 1) VMEM
    # o_ref: (1, K, TN) VMEM
    x = x_ref[0]                       # (C, TN)
    w = w_ref[...]                     # (K, C)
    c_dim = x.shape[0]
    acc = w[:, 0:1] * x[0:1, :]        # (K, TN) broadcasted outer product (VPU)
    for cc in range(1, c_dim):         # static unroll over small C
        acc = acc + w[:, cc:cc + 1] * x[cc:cc + 1, :]
    o_ref[0] = (acc - b_ref[...]).astype(o_ref.dtype)


def _pca_kernel_mxu(x_ref, w_ref, b_ref, o_ref):
    # Same operands; contraction over C on the MXU. Only dispatched when both
    # C and K are large enough to fill the systolic array.
    out = jnp.dot(w_ref[...], x_ref[0], preferred_element_type=jnp.float32)
    o_ref[0] = (out - b_ref[...]).astype(o_ref.dtype)


def _round_up(v, m):
    return (v + m - 1) // m * m


def pca_reduce(x, means, loadings, *, tn_max=8192, vmem_budget_bytes=24 << 20):
    """x: (B, C, H, W); means: (C,); loadings: (K, C) -> (B, K, H, W) f32."""
    b, c, h, w = x.shape
    k = loadings.shape[0]
    hw = h * w

    x32 = x.astype(jnp.float32).reshape(b, c, hw)            # free NCHW reshape
    wmat = loadings.astype(jnp.float32)                      # (K, C)
    bias = jnp.dot(wmat, means.astype(jnp.float32)).reshape(k, 1)  # W @ means

    # Spatial (lane) tile: as large as fits a conservative VMEM budget
    # (double-buffered input + output tiles), multiple of 128 lanes.
    per_col_bytes = 2 * (c + k) * 4 * 2        # 2 bufs * (in+out columns) * f32
    tn_fit = max(128, (vmem_budget_bytes // per_col_bytes) // 128 * 128)
    tn = min(tn_max, tn_fit)
    n_pad = _round_up(hw, 128)
    if n_pad <= tn:
        tn = n_pad                              # one spatial tile per batch
    else:
        n_pad = _round_up(hw, tn)
    if n_pad != hw:
        x32 = jnp.pad(x32, ((0, 0), (0, 0), (0, n_pad - hw)))

    grid = (b, n_pad // tn)
    kernel = _pca_kernel_mxu if (c >= 128 and k >= 128) else _pca_kernel_vpu

    cost = pl.CostEstimate(
        flops=2 * b * n_pad * c * k,
        transcendentals=0,
        bytes_accessed=4 * (b * n_pad * c + b * n_pad * k + k * c + k),
    )

    out = pl.pallas_call(
        kernel,
        out_shape=jax.ShapeDtypeStruct((b, k, n_pad), jnp.float32),
        grid_spec=pltpu.PrefetchScalarGridSpec(
            num_scalar_prefetch=0,
            grid=grid,
            in_specs=[
                pl.BlockSpec((1, c, tn), lambda bi, ji: (bi, 0, ji)),  # x tile
                pl.BlockSpec((k, c), lambda bi, ji: (0, 0)),           # W (resident)
                pl.BlockSpec((k, 1), lambda bi, ji: (0, 0)),           # bias (resident)
            ],
            out_specs=pl.BlockSpec((1, k, tn), lambda bi, ji: (bi, 0, ji)),
        ),
        compiler_params=pltpu.CompilerParams(
            # Independent grid axes -> megacore sharding on v7x; no-op v5e/v6e.
            dimension_semantics=("parallel", "parallel"),
        ),
        cost_estimate=cost,
    )(x32, wmat, bias)

    if n_pad != hw:
        out = out[:, :, :hw]
    return out.reshape(b, k, h, w)


def pca_reduce_ref(x, means, loadings):
    """Pure-JAX reference mirroring the PyTorch forward."""
    b, c, h, w = x.shape
    k = loadings.shape[0]
    projected = x - means.reshape(1, c, 1, 1)
    projected = jnp.transpose(projected, (0, 2, 3, 1)).reshape(b, h * w, c)
    projected = jnp.matmul(projected, loadings.T)
    return jnp.transpose(projected.reshape(b, h, w, k), (0, 3, 1, 2))


if __name__ == "__main__":
    # Small shapes consistent with the module: batch=2, channels=4, spatial=16,
    # reduce_dim=8.
    B, C, H, W = 2, 4, 16, 16
    K = 8  # reduce_dim

    key = jax.random.PRNGKey(0)
    kx, km, kl = jax.random.split(key, 3)
    x = jax.random.normal(kx, (B, C, H, W), dtype=jnp.float32)
    means = jax.random.normal(km, (C,), dtype=jnp.float32)
    loadings = jax.random.normal(kl, (K, C), dtype=jnp.float32)

    out = jax.block_until_ready(pca_reduce(x, means, loadings))

    ref = pca_reduce_ref(x, means, loadings)
    assert out.shape == (B, K, H, W), out.shape
    assert jnp.allclose(out, ref, atol=1e-5, rtol=1e-5), "mismatch vs reference"

    print("KERNEL_OK")
</pallas_src>

<mosaic_0001>
module attributes {stable_mosaic.version = 11 : i64} {
  func.func @_pca_kernel_vpu(%arg0: i32, %arg1: i32, %arg2: memref<1x4x256xf32, #tpu.memory_space<vmem>>, %arg3: memref<8x4xf32, #tpu.memory_space<vmem>>, %arg4: memref<8x1xf32, #tpu.memory_space<vmem>>, %arg5: memref<1x8x256xf32, #tpu.memory_space<vmem>>) attributes {dimension_semantics = [#tpu.dimension_semantics<parallel>, #tpu.dimension_semantics<parallel>], iteration_bounds = array<i64: 2, 1>, scalar_prefetch = 0 : i64, scratch_operands = 0 : i64, tpu.core_type = #tpu.core_type<tc>, window_params = [{transform_indices = @transform_0, window_bounds = array<i64: 1, 4, 256>}, {pipeline_mode = #tpu.pipeline_mode<synchronous>, transform_indices = @transform_1, window_bounds = array<i64: 8, 4>}, {pipeline_mode = #tpu.pipeline_mode<synchronous>, transform_indices = @transform_2, window_bounds = array<i64: 8, 1>}, {transform_indices = @transform_3, window_bounds = array<i64: 1, 8, 256>}]} {
    %c0 = arith.constant 0 : index
    %c0_0 = arith.constant 0 : index
    %c0_1 = arith.constant 0 : index
    %0 = vector.load %arg2[%c0, %c0_0, %c0_1] : memref<1x4x256xf32, #tpu.memory_space<vmem>>, vector<1x4x256xf32>
    %1 = vector.shape_cast %0 : vector<1x4x256xf32> to vector<4x256xf32>
    %c0_2 = arith.constant 0 : index
    %c0_3 = arith.constant 0 : index
    %2 = vector.load %arg3[%c0_2, %c0_3] : memref<8x4xf32, #tpu.memory_space<vmem>>, vector<8x4xf32>
    %3 = vector.extract_strided_slice %2 {offsets = [0, 0], sizes = [8, 1], strides = [1, 1]} : vector<8x4xf32> to vector<8x1xf32>
    %4 = vector.extract_strided_slice %1 {offsets = [0, 0], sizes = [1, 256], strides = [1, 1]} : vector<4x256xf32> to vector<1x256xf32>
    %5 = vector.broadcast %3 : vector<8x1xf32> to vector<8x256xf32>
    %6 = vector.broadcast %4 : vector<1x256xf32> to vector<8x256xf32>
    %7 = arith.mulf %5, %6 : vector<8x256xf32>
    %8 = vector.extract_strided_slice %2 {offsets = [0, 1], sizes = [8, 1], strides = [1, 1]} : vector<8x4xf32> to vector<8x1xf32>
    %9 = vector.extract_strided_slice %1 {offsets = [1, 0], sizes = [1, 256], strides = [1, 1]} : vector<4x256xf32> to vector<1x256xf32>
    %10 = vector.broadcast %8 : vector<8x1xf32> to vector<8x256xf32>
    %11 = vector.broadcast %9 : vector<1x256xf32> to vector<8x256xf32>
    %12 = arith.mulf %10, %11 : vector<8x256xf32>
    %13 = arith.addf %7, %12 : vector<8x256xf32>
    %14 = vector.extract_strided_slice %2 {offsets = [0, 2], sizes = [8, 1], strides = [1, 1]} : vector<8x4xf32> to vector<8x1xf32>
    %15 = vector.extract_strided_slice %1 {offsets = [2, 0], sizes = [1, 256], strides = [1, 1]} : vector<4x256xf32> to vector<1x256xf32>
    %16 = vector.broadcast %14 : vector<8x1xf32> to vector<8x256xf32>
    %17 = vector.broadcast %15 : vector<1x256xf32> to vector<8x256xf32>
    %18 = arith.mulf %16, %17 : vector<8x256xf32>
    %19 = arith.addf %13, %18 : vector<8x256xf32>
    %20 = vector.extract_strided_slice %2 {offsets = [0, 3], sizes = [8, 1], strides = [1, 1]} : vector<8x4xf32> to vector<8x1xf32>
    %21 = vector.extract_strided_slice %1 {offsets = [3, 0], sizes = [1, 256], strides = [1, 1]} : vector<4x256xf32> to vector<1x256xf32>
    %22 = vector.broadcast %20 : vector<8x1xf32> to vector<8x256xf32>
    %23 = vector.broadcast %21 : vector<1x256xf32> to vector<8x256xf32>
    %24 = arith.mulf %22, %23 : vector<8x256xf32>
    %25 = arith.addf %19, %24 : vector<8x256xf32>
    %c0_4 = arith.constant 0 : index
    %c0_5 = arith.constant 0 : index
    %26 = vector.load %arg4[%c0_4, %c0_5] : memref<8x1xf32, #tpu.memory_space<vmem>>, vector<8x1xf32>
    %27 = vector.broadcast %26 : vector<8x1xf32> to vector<8x256xf32>
    %28 = arith.subf %25, %27 : vector<8x256xf32>
    %c0_6 = arith.constant 0 : index
    %c0_7 = arith.constant 0 : index
    %c0_8 = arith.constant 0 : index
    %29 = vector.load %arg5[%c0_6, %c0_7, %c0_8] : memref<1x8x256xf32, #tpu.memory_space<vmem>>, vector<1x8x256xf32>
    %30 = vector.shape_cast %29 : vector<1x8x256xf32> to vector<8x256xf32>
    %31 = vector.shape_cast %28 : vector<8x256xf32> to vector<1x8x256xf32>
    tpu.vector_store %arg5[%c0_6, %c0_7, %c0_8], %31 {strides = array<i32>} : memref<1x8x256xf32, #tpu.memory_space<vmem>>, vector<1x8x256xf32>,
    return
  }
  func.func @transform_0(%arg0: i32, %arg1: i32) -> (i32, i32, i32) {
    %c0_i32 = arith.constant 0 : i32
    %c0_i32_0 = arith.constant 0 : i32
    return %arg0, %c0_i32, %arg1 : i32, i32, i32
  }
  func.func @transform_1(%arg0: i32, %arg1: i32) -> (i32, i32) {
    %c0_i32 = arith.constant 0 : i32
    %c0_i32_0 = arith.constant 0 : i32
    %c0_i32_1 = arith.constant 0 : i32
    return %c0_i32, %c0_i32_0 : i32, i32
  }
  func.func @transform_2(%arg0: i32, %arg1: i32) -> (i32, i32) {
    %c0_i32 = arith.constant 0 : i32
    %c0_i32_0 = arith.constant 0 : i32
    %c0_i32_1 = arith.constant 0 : i32
    return %c0_i32, %c0_i32_0 : i32, i32
  }
  func.func @transform_3(%arg0: i32, %arg1: i32) -> (i32, i32, i32) {
    %c0_i32 = arith.constant 0 : i32
    %c0_i32_0 = arith.constant 0 : i32
    return %arg0, %c0_i32, %arg1 : i32, i32, i32
  }
}

</mosaic_0001>

<bundles_post_ra>
// kernel: tpu_custom_call.1
= control target key start
LH: loop header
LB: loop body
LE: loop exit
PB: predicated region body
PF: predicated region fallthrough
CT: control target
= control target key end

     0   :  { %8 = vsyncpa [#allocation3], 0  ;;  %s654_s0 = inlined_call_operand.vmem [shape: f32[2,4,256], index: 0, kind: input, shape index: {}]   ;;  %s655_s1 = inlined_call_operand.vmem [shape: f32[8,4], index: 1, kind: input, shape index: {}]   ;;  %s656_s2 = inlined_call_operand.vmem [shape: f32[8,1], index: 2, kind: input, shape index: {}]   ;;  %s657_s3 = inlined_call_operand.hbm [shape: f32[2,8,256], index: 3, kind: output, shape index: {}]  }
   0x1   :  { %10 = vsyncpa [#allocation3 + $0x1], 0  ;;  %s547_s12 = smov 0   ;;  %s549_s13 = smov 0  }
   0x2   :  { %s551_s14 = smov 0   ;;  %s553_s15 = smov 0  }
   0x3   :  { %s555_s16 = smov 0   ;;  %s557_s17 = smov 0  }
   0x4 LB: > { %s363_s18 = sadd.s32 4294967295, %s521_s17   ;;  %s364_s19 = sadd.s32 4294967294, %s521_s17   ;;  %s521_s17 = sphi %s557_s17, %s16_s17   ;;  %s517_s16 = sphi %s555_s16, %s664_s16   ;;  %s513_s15 = sphi %s553_s15, %s663_s15   ;;  %s509_s14 = sphi %s551_s14, %s662_s14   ;;  %s505_s13 = sphi %s549_s13, %s661_s13   ;;  %s501_s12 = sphi %s547_s12, %s660_s12  }
   0x5   : > { %s28_s20 = sadd.s32 1, %s517_s16  ;;  %s107_s21 = sadd.s32 1, %s509_s14 }
   0x6   : > { %p30_p0 = scmp.ge.s32.totalorder %s28_s20, 2  ;;  %p117_p1 = scmp.ne.s32.totalorder %s509_s14, %s505_s13 }
   0x7   : > { %p118_p2 = scmp.eq.s32.totalorder %s363_s18, 1  ;;  %p123_p3 = scmp.ne.s32.totalorder %s505_s13, %s501_s12 }
   0x8   : > { %s666_s20 = smov (%p30_p0, %s28_s20), 0  ;;  %p124_p5 = scmp.eq.s32.totalorder %s364_s19, 1 }
   0x9   : > { %p587_p4 = por %p118_p2, %p117_p1  ;;  %s102_s23 = ssub.s32 %s517_s16, %s666_s20 }
   0xa   : > { %p367_p6 = scmp.ge.s32.totalorder %s521_s17, 1  ;;  %p105_p7 = scmp.eq.s32.totalorder %s102_s23, 0 }
   0xb   : > { %p594_p8 = por %p124_p5, %p123_p3  ;;  %p161_p9 = scmp.lt.s32.totalorder %s521_s17, 3 }
   0xc   : > { %s600_s25 = scalar_select %p105_p7, %s509_s14, %s107_s21  }
   0xd   : > { %p162_p10 = pnand %p367_p6, %p161_p9 }
   0xe   : > { %p190_p11 = scmp.lt.s32.totalorder (!%p162_p10), %s513_s15, 1  ;;  %s186_s8 = sand.u32 (!%p162_p10), 1, %s505_s13  }
   0xf   : > { %165 = sbr.rel (%p162_p10) target bundleno = 160 (0xa0), region = 32  ;;  %s368_s9 = sshll.u32 (!%p162_p10), %s186_s8, 4 }
  0x10   : > { %s377_s10 = sshll.u32 (!%p162_p10), %s513_s15, 4  ;;  %s188_s21 = scalar_lea.vmem (!%p162_p10), [#allocation2], %s368_s9 }
  0x11   : > { %s282_s19 = scalar_lea.hbm (!%p162_p10), %s657_s3, %s377_s10  ;;  %s284_s23 = sshll.u32 (!%p162_p10), %s188_s21, 4  ;;  %s285_s23 = int_to_ptr.vmem [resolvable:$true] %s284_s23 }
  0x12   : > { %s269_s26 = scalar_lea.sflag (!%p162_p10), [#allocation3], %s186_s8 }
  0x14   : > { %v201_v0 = vld [vmem:[%s655_s1] sm:$0xff]  ;;  %v523_v1 = vmov 0   ;;  %v524_v2 = vmov 2   ;;  %v525_v4 = vmov 1   ;;  %v526_v5 = vmov 3   ;;  %s191_s30 = scalar_select %p190_p11, %s513_s15, 1 }
  0x15   : > { %437 = vset.pattern.permute.xlu0 %v523_v1  ;;  %439 = vset.pattern.permute.xlu1 %v524_v2  ;;  %v258_v3 = vld [vmem:[%s656_s2] sm:$0xff]  ;;  %s286_s15 = sshll.u32 %s282_s19, 4  ;;  %s287_s15 = int_to_ptr.hbm [resolvable:$true] %s286_s15 }
  0x16   : > { %204 = vperm.xlu0 %437, %v201_v0   ;;  %231 = vperm.xlu1 %439, %v201_v0   ;;  %s376_s4 = sshll.u32 %s191_s30, 3  ;;  %s457_s27 = sshra.s32 %s287_s15, 4  ;;  %s458_s27 = int_to_ptr.hbm [resolvable:$true] %s457_s27 }
  0x17   : > { %441 = vset.pattern.permute.xlu2 %v523_v1  ;;  %s197_s7 = scalar_lea.vmem %s654_s0, %s376_s4  ;;  %s459_s28 = scalar_lea.hbm %s458_s27, 16 }
  0x18   : > { %261 = vperm.xlu2 %441, %v258_v3   ;;  %v200_v6 = vld [vmem:[%s197_s7] sm:$0xff]  ;;  %p460_p12 = scmp.ne.s32.totalorder %s458_s27, %s459_s28  ;;  %s463_s4 = scalar_lea.hbm %s657_s3, 32 }
  0x19   : > { %v208_v9 = vperm.slane %v200_v6, 0  ;;  %v209_v10 = vperm.slane %v200_v6, 4  ;;  %v220_v11 = vperm.slane %v200_v6, 1  ;;  %v221_v12 = vperm.slane %v200_v6, 5  ;;  %p464_p1 = scmp.lt.s32.totalorder %s458_s27, %s657_s3  ;;  %p465_p2 = scmp.lt.s32.totalorder %s463_s4, %s459_s28 }
  0x1a   : > { %v234_v13 = vperm.slane %v200_v6, 2  ;;  %v235_v14 = vperm.slane %v200_v6, 6  ;;  %v248_v15 = vperm.slane %v200_v6, 3  ;;  %v249_v16 = vperm.slane %v200_v6, 7  ;;  %p461_p13 = pnand %p460_p12, %p587_p4 }
  0x1b   : > { %v212_v17 = vperm.slane %v208_v9, 0  ;;  %v213_v18 = vperm.slane %v209_v10, 0  ;;  %v224_v19 = vperm.slane %v220_v11, 1  ;;  %v225_v20 = vperm.slane %v221_v12, 1  ;;  %p466_p3 = por %p465_p2, %p464_p1 }
  0x1c   : > { %v238_v21 = vperm.slane %v234_v13, 2  ;;  %v239_v22 = vperm.slane %v235_v14, 2  ;;  %v252_v23 = vperm.slane %v248_v15, 3  ;;  %v253_v24 = vperm.slane %v249_v16, 3  ;;  %p462_p0 = pneg %p461_p13 }
  0x1e   : > { %438 = vset.pattern.permute.xlu0 %v525_v4  ;;  %440 = vset.pattern.permute.xlu1 %v526_v5  ;;  %p467_p5 = pnand %p466_p3, %p462_p0 }
  0x1f   : > { %217 = vperm.xlu0 %438, %v201_v0   ;;  %245 = vperm.xlu1 %440, %v201_v0  }
  0x27   : > { %442 = vset.pattern.permute.xlu0 %v523_v1 }
  0x72   : > { %v262_v39 = vpop.permute.xlu2 %261 }
  0x88   : > { %v205_v7 = vpop.permute.xlu0 %204  ;;  %v232_v8 = vpop.permute.xlu1 %231 }
  0x89   : > { %v214_v27 = vmul.f32 %v212_v17, %v205_v7  ;;  %v215_v28 = vmul.f32 %v213_v18, %v205_v7  ;;  %v240_v31 = vmul.f32 %v238_v21, %v232_v8  ;;  %v241_v32 = vmul.f32 %v239_v22, %v232_v8 }
  0x91   : > { %v218_v25 = vpop.permute.xlu0 %217  ;;  %v246_v26 = vpop.permute.xlu1 %245 }
  0x92   : > { %v226_v29 = vmul.f32 %v224_v19, %v218_v25  ;;  %v227_v30 = vmul.f32 %v225_v20, %v218_v25  ;;  %v254_v35 = vmul.f32 %v252_v23, %v246_v26  ;;  %v255_v36 = vmul.f32 %v253_v24, %v246_v26 }
  0x94   : > { %v228_v33 = vadd.f32 %v226_v29, %v214_v27  ;;  %v229_v34 = vadd.f32 %v227_v30, %v215_v28 }
  0x96   : > { %v242_v37 = vadd.f32 %v240_v31, %v228_v33  ;;  %v243_v38 = vadd.f32 %v241_v32, %v229_v34 }
  0x98   : > { %v256_v40 = vadd.f32 %v254_v35, %v242_v37  ;;  %v257_v41 = vadd.f32 %v255_v36, %v243_v38 }
  0x9a   : > { %v264_v42 = vsub.f32 %v256_v40, %v262_v39  ;;  %v265_v43 = vsub.f32 %v257_v41, %v262_v39 }
  0x9c   : > { %266 = vst [vmem:[%s188_s21] sm:$0xff] %v264_v42 }
  0x9d   : > { %267 = vst [vmem:[%s188_s21 + $0x8] sm:$0xff] %v265_v43 }
  0x9e   : > { %470 = shalt.err (!%p467_p5)
}
  0x9f   : > { %378 = dma.vmem_to_hbm [thread:$0]  (%p587_p4), %s285_s23, 256, %s287_s15, %s269_s26  }
  0xa0 PF: > { %p384_p6 = scmp.ge.s32.totalorder %s521_s17, 2  ;;  %s298_s7 = sand.u32 1, %s501_s12  }
  0xa1   : > { %s299_s8 = scalar_lea.sflag [#allocation3], %s298_s7 }
  0xa2   : > { %p381_p7 = pnand %p384_p6, %p594_p8 }
  0xa4   : > { %p382_p9 = pneg %p381_p7 }
  0xa6   : > { %496 = dma.done.wait (%p382_p9), %s299_s8, 256  }
  0xa7   : > { %498 = vsyncadd (%p382_p9), %s299_s8, 4294967040  ;;  %s16_s17 = sadd.s32 1, %s521_s17   ;;  %s660_s12 = smov %s505_s13 }
  0xa8   : > { %p13_p10 = scmp.ge.s32.totalorder %s16_s17, 4   ;;  %s661_s13 = smov %s509_s14 }
  0xa9   : > { %s662_s14 = smov %s600_s25  ;;  %s663_s15 = smov %s517_s16 }
  0xaa   : > { %s664_s16 = smov %s666_s20  ;;  %15 = sbr.rel (!%p13_p10) target bundleno = 4 (0x4), region = 67 }
  0xaf   :  { %305 = vsyncpa [#allocation3], 1 }
  0xb0   :  { %307 = vsyncpa [#allocation3 + $0x1], 1 }

</bundles_post_ra>
